<compile_context>
chip_gen: v5e
topology: v5e:2x2
jax: 0.10.0
libtpu: 0.0.40
codegen_flags: <defaults>
</compile_context>

<pallas_src>
import functools

import jax
import jax.numpy as jnp
from jax.experimental import pallas as pl
from jax.experimental.pallas import tpu as pltpu

LANE = 128
MAX_INSTANCES = 4        # instance ids assumed in {1..MAX_INSTANCES}; 0 = background, 200 = ignore
MAX_TILE_ROWS = 2048     # 1 MiB per f32 stream per buffer
VMEM_LIMIT_BYTES = 32 * 1024 * 1024   # >= v5e's 16 MiB default, <= physical VMEM everywhere
NEG_PAD = -1.0e4         # logit pad value: sigmoid()==0 and softplus()==0 exactly in f32


# --------------------------------------------------------------------------
# Fused per-pixel loss-sums kernel (seg BCE + IoU sums [+ offset BCE + z MSE])
# --------------------------------------------------------------------------
def _loss_sums_kernel(*refs, with_offset_z):
    """Accumulates vreg-shaped partial sums directly into the resident output block.

    Output slots (each an (8,128) f32 partial sum):
      0: pos-weighted BCEWithLogits(pred, gt_seg)          (pos_weight = 10)
      1: sum sigmoid(pred)
      2: sum gt_seg
      3: sum sigmoid(pred) * gt_seg                        (IoU intersection)
      4: BCELoss(sigmoid(offset)*gt_seg, gt_offset) sum    [only if with_offset_z]
      5: squared-error sum of sigmoid(z)*gt_seg vs gt_z    [only if with_offset_z]
    """
    if with_offset_z:
        pred_ref, seg_ref, off_ref, z_ref, gt_off_ref, gt_z_ref, out_ref = refs
    else:
        pred_ref, seg_ref, out_ref = refs

    @pl.when(pl.program_id(0) == 0)
    def _init():
        out_ref[...] = jnp.zeros_like(out_ref)

    def vreg_sum(v):
        # (tile_rows, 128) -> (8, 128): tile-aligned reshape + VPU vreg adds only;
        # the single cross-lane reduction happens once, outside the kernel.
        return jnp.sum(v.reshape(-1, 8, LANE), axis=0)

    x = pred_ref[...].astype(jnp.float32)
    t = seg_ref[...].astype(jnp.float32)

    # Shared transcendentals: one exp + one log per element; EUP reciprocal for sigmoid.
    e = jnp.exp(-jnp.abs(x))
    log1pe = jnp.log1p(e)
    sp_pos = jnp.maximum(x, 0.0) + log1pe            # softplus(x)  = -log(1 - sigmoid(x))
    sp_neg = sp_pos - x                              # softplus(-x) = -log(sigmoid(x))
    sig = jnp.where(x >= 0.0, 1.0, e) * pl.reciprocal(1.0 + e, approx=True)

    sums = [
        vreg_sum(10.0 * t * sp_neg + (1.0 - t) * sp_pos),   # weighted BCE
        vreg_sum(sig),
        vreg_sum(t),
        vreg_sum(sig * t),
    ]

    if with_offset_z:
        xo = off_ref[...].astype(jnp.float32)
        to = gt_off_ref[...].astype(jnp.float32)
        eo = jnp.exp(-jnp.abs(xo))
        l1o = jnp.log1p(eo)
        spo_pos = jnp.maximum(xo, 0.0) + l1o
        spo_neg = spo_pos - xo
        # BCELoss(sigmoid(off)*seg, gt_off) rewritten in logit space (seg is a 0/1 mask,
        # PyTorch clamps log at -100):
        #   seg==1: t*min(softplus(-x),100) + (1-t)*min(softplus(x),100)
        #   seg==0: p == 0  ->  100*t
        bce_off = jnp.where(
            t > 0.5,
            to * jnp.minimum(spo_neg, 100.0) + (1.0 - to) * jnp.minimum(spo_pos, 100.0),
            100.0 * to)
        sums.append(vreg_sum(bce_off))

        xz = z_ref[...].astype(jnp.float32)
        ez = jnp.exp(-jnp.abs(xz))
        sigz = jnp.where(xz >= 0.0, 1.0, ez) * pl.reciprocal(1.0 + ez, approx=True)
        diff = sigz * t - gt_z_ref[...].astype(jnp.float32)
        sums.append(vreg_sum(diff * diff))

    # One fused read-modify-write of the small resident accumulator block.
    out_ref[...] += jnp.stack(sums)


# --------------------------------------------------------------------------
# NDPushPullLoss kernel (grid over batch, lane-dense (hw/128, 128) layout)
# --------------------------------------------------------------------------
def _pushpull_kernel(emb_ref, inst_ref, out_ref, *, max_instances, margin_var, margin_mean):
    # TODO(synk): the exact NDPushPullLoss reference (hinge squaring / pair normalization)
    # is not in the provided module source; non-squared hinges over ordered pairs are used.
    feat = emb_ref[0].astype(jnp.float32)    # (C_emb, R, 128)
    inst = inst_ref[0].astype(jnp.float32)   # (R, 128)

    masks, centers, presents, inv_cnts = [], [], [], []
    for k in range(1, max_instances + 1):                       # static loop over ids
        mask = (jnp.abs(inst - float(k)) < 0.5).astype(jnp.float32)   # (R, 128)
        cnt = jnp.sum(mask)
        pres = (cnt > 0.0).astype(jnp.float32)
        safe = jnp.maximum(cnt, 1.0)
        center = jnp.sum(feat * mask[None], axis=(1, 2), keepdims=True) / safe   # (C,1,1)
        masks.append(mask)
        centers.append(center)
        presents.append(pres)
        inv_cnts.append(pres / safe)

    # Per-pixel own-instance center + per-pixel weight -> single sqrt/hinge pass.
    center_px = masks[0][None] * centers[0]
    w_px = masks[0] * inv_cnts[0]
    pull_cnt = presents[0]
    for k in range(1, max_instances):
        center_px = center_px + masks[k][None] * centers[k]
        w_px = w_px + masks[k] * inv_cnts[k]
        pull_cnt = pull_cnt + presents[k]
    dist = jnp.sqrt(jnp.sum((feat - center_px) ** 2, axis=0))       # (R, 128)
    pull_sum = jnp.sum(jnp.maximum(dist - margin_var, 0.0) * w_px)

    push_sum = jnp.float32(0.0)
    push_cnt = jnp.float32(0.0)
    for i in range(max_instances):
        for j in range(max_instances):
            if i == j:
                continue
            d = jnp.sqrt(jnp.sum((centers[i] - centers[j]) ** 2))
            valid = presents[i] * presents[j]
            push_sum += valid * jnp.maximum(margin_mean - d, 0.0)
            push_cnt += valid

    # Lane-dense output block: row r of the (8,128) block carries sum r (read lane 0 outside).
    row = jax.lax.broadcasted_iota(jnp.int32, (8, LANE), 0)
    out_ref[0] = jnp.where(row == 0, pull_sum,
                 jnp.where(row == 1, pull_cnt,
                 jnp.where(row == 2, push_sum,
                 jnp.where(row == 3, push_cnt, 0.0))))


# --------------------------------------------------------------------------
# Wrappers (glue)
# --------------------------------------------------------------------------
def _plan_tiling(n_elems):
    """Near-equal tile split: tile_rows (multiple of 16, <= ~MAX_TILE_ROWS), num tiles."""
    rows0 = -(-n_elems // LANE)
    if rows0 <= MAX_TILE_ROWS:
        ntiles = 1
    else:
        ntiles = -(-rows0 // MAX_TILE_ROWS)
    tile_rows = ((-(-rows0 // ntiles) + 15) // 16) * 16
    return tile_rows, ntiles


def _prep_stream(x, pad_value, padded_rows):
    """Flatten to (padded_rows, 128) in the ORIGINAL dtype; pad only the (tiny) tail."""
    flat = x.reshape(-1)
    total = padded_rows * LANE
    n = flat.shape[0]
    if total != n:
        flat = jnp.pad(flat, (0, total - n), constant_values=pad_value)
    return flat.reshape(padded_rows, LANE)


def _loss_sums(arrays, pad_values, with_offset_z):
    n_sums = 6 if with_offset_z else 4
    n = int(arrays[0].size)
    tile_rows, ntiles = _plan_tiling(n)
    padded_rows = tile_rows * ntiles
    mats = [_prep_stream(a, pv, padded_rows) for a, pv in zip(arrays, pad_values)]

    kernel = functools.partial(_loss_sums_kernel, with_offset_z=with_offset_z)
    partial_sums = pl.pallas_call(
        kernel,
        out_shape=jax.ShapeDtypeStruct((n_sums, 8, LANE), jnp.float32),
        grid=(ntiles,),
        in_specs=[pl.BlockSpec((tile_rows, LANE), lambda i: (i, 0)) for _ in mats],
        out_specs=pl.BlockSpec((n_sums, 8, LANE), lambda i: (0, 0, 0)),
        compiler_params=pltpu.CompilerParams(
            dimension_semantics=("arbitrary",),
            vmem_limit_bytes=VMEM_LIMIT_BYTES),
    )(*mats)
    # Tiny final cross-lane reduction (n_sums, 8, 128) -> (n_sums,) done outside the kernel.
    return jnp.sum(partial_sums, axis=(1, 2))


def _seg_iou_from_sums(sums4, numel, smooth=1.0):
    bce = sums4[0] / numel
    inter = sums4[3]
    union = sums4[1] + sums4[2] - inter
    iou = (inter + smooth) / (union + smooth)
    return bce + (1.0 - iou)


def bev_losses(pred, gt_seg, offset_y, z, gt_offset_y, gt_z):
    """Fused: seg BCE+IoU, offset BCE, z MSE in a single pass over the BEV maps."""
    sums = _loss_sums(
        [pred, gt_seg, offset_y, z, gt_offset_y, gt_z],
        [NEG_PAD, 0.0, NEG_PAD, NEG_PAD, 0.0, 0.0],
        with_offset_z=True)
    numel = pred.size
    loss_seg = _seg_iou_from_sums(sums[:4], numel)
    loss_offset = sums[4] / numel
    loss_z = sums[5] / numel
    return loss_seg, loss_offset, loss_z


def seg_plus_iou_loss(pred, gt_seg):
    """BCEWithLogitsLoss(pos_weight=10)(pred, gt) + IoULoss(sigmoid(pred), gt)."""
    sums = _loss_sums([pred, gt_seg], [NEG_PAD, 0.0], with_offset_z=False)
    return _seg_iou_from_sums(sums, pred.size)


def nd_push_pull_loss(emb, gt_instance, var_weight=1.0, mean_weight=1.0,
                      margin_var=1.0, margin_mean=5.0, max_instances=MAX_INSTANCES):
    # TODO(synk): torch.unique over data-dependent instance ids has no clean Pallas
    # equivalent; ids are assumed to lie in {1..max_instances} (background=0 and the
    # ignore label 200 fall outside that range and are excluded).
    B, C, H, W = emb.shape
    hw = H * W
    rows = -(-hw // LANE)
    hw_pad = rows * LANE
    emb_r = emb.reshape(B, C, hw)
    inst_r = gt_instance.reshape(B, hw)
    if hw_pad != hw:
        # Pad with 0 = background id: padded pixels belong to no instance -> contribute 0.
        emb_r = jnp.pad(emb_r, ((0, 0), (0, 0), (0, hw_pad - hw)))
        inst_r = jnp.pad(inst_r, ((0, 0), (0, hw_pad - hw)))
    emb_r = emb_r.reshape(B, C, rows, LANE)      # lane-dense: minor dims (rows, 128)
    inst_r = inst_r.reshape(B, rows, LANE)

    kernel = functools.partial(
        _pushpull_kernel, max_instances=max_instances,
        margin_var=float(margin_var), margin_mean=float(margin_mean))
    out = pl.pallas_call(
        kernel,
        out_shape=jax.ShapeDtypeStruct((B, 8, LANE), jnp.float32),
        grid=(B,),
        in_specs=[pl.BlockSpec((1, C, rows, LANE), lambda b: (b, 0, 0, 0)),
                  pl.BlockSpec((1, rows, LANE), lambda b: (b, 0, 0))],
        out_specs=pl.BlockSpec((1, 8, LANE), lambda b: (b, 0, 0)),
        compiler_params=pltpu.CompilerParams(
            dimension_semantics=("parallel",),
            vmem_limit_bytes=VMEM_LIMIT_BYTES),
    )(emb_r, inst_r)
    sums = jnp.sum(out[:, :4, 0], axis=0)   # [pull_sum, pull_cnt, push_sum, push_cnt]
    pull = jnp.where(sums[1] > 0, sums[0] / jnp.maximum(sums[1], 1.0), 0.0) * var_weight
    push = jnp.where(sums[3] > 0, sums[2] / jnp.maximum(sums[3], 1.0), 0.0) * mean_weight
    return pull + push


def loss_calculator_forward(outputs, gt, is_train=True):
    """JAX/Pallas port of LossCalculator.forward."""
    if not is_train:
        return {}
    pred, emb, offset_y, z = outputs['lane_outputs']
    pred_2d, emb_2d = outputs['lane_2d_outputs']
    depth_map = outputs.get('depth_map', None)
    distillation_feature = outputs.get('distillation_feature', None)

    # BEV branch: one fused elementwise pass (each map read from HBM once) + push/pull.
    loss_seg, loss_offset, loss_z = bev_losses(
        pred, gt['gt_seg'], offset_y, z, gt['gt_offset_y'], gt['gt_z'])
    loss_emb = nd_push_pull_loss(emb, gt['gt_instance'])
    loss_total = 3.0 * loss_seg + 0.5 * loss_emb

    # 2D (image) branch.
    loss_seg_2d = seg_plus_iou_loss(pred_2d, gt['image_gt_segment'])
    loss_emb_2d = nd_push_pull_loss(emb_2d, gt['image_gt_instance'])
    loss_total_2d = 3.0 * loss_seg_2d + 0.5 * loss_emb_2d

    # TODO(synk): CombinedDepthLoss / FeatureDistillationLoss external to module source.
    loss_depth = 0.0 if depth_map is None else 0.0
    distillation_loss = 0.0 if distillation_feature is None else 0.0

    loss_total_combined = (loss_total + 0.5 * loss_total_2d + 60.0 * loss_offset
                           + 30.0 * loss_z + loss_depth + distillation_loss)
    return {
        'loss_total_combined': loss_total_combined,
        'loss_total_2d': loss_total_2d,
        'loss_offset': loss_offset,
        'loss_z': loss_z,
        'loss_depth': loss_depth,
        'distillation_loss': distillation_loss,
    }


# --------------------------------------------------------------------------
# Main
# --------------------------------------------------------------------------
if __name__ == "__main__":
    key = jax.random.PRNGKey(0)
    B, H, W = 2, 16, 16       # BEV branch
    H2, W2 = 16, 16           # image (2D) branch
    ks = jax.random.split(key, 12)

    pred = jax.random.normal(ks[0], (B, 1, H, W), jnp.float32)
    gt_seg = (jax.random.uniform(ks[1], (B, 1, H, W)) > 0.7).astype(jnp.float32)
    emb = jax.random.normal(ks[2], (B, 2, H, W), jnp.float32)
    gt_instance = jnp.floor(jax.random.uniform(ks[3], (B, 1, H, W)) * 5.0)  # ids 0..4
    offset_y = jax.random.normal(ks[4], (B, 1, H, W), jnp.float32)
    gt_offset_y = jax.random.uniform(ks[5], (B, 1, H, W)) * gt_seg
    z = jax.random.normal(ks[6], (B, 1, H, W), jnp.float32)
    gt_z = jax.random.uniform(ks[7], (B, 1, H, W)) * gt_seg

    pred_2d = jax.random.normal(ks[8], (B, 1, H2, W2), jnp.float32)
    image_gt_segment = (jax.random.uniform(ks[9], (B, 1, H2, W2)) > 0.7).astype(jnp.float32)
    emb_2d = jax.random.normal(ks[10], (B, 2, H2, W2), jnp.float32)
    image_gt_instance = jnp.floor(jax.random.uniform(ks[11], (B, 1, H2, W2)) * 5.0)

    outputs = {
        'lane_outputs': (pred, emb, offset_y, z),
        'lane_2d_outputs': (pred_2d, emb_2d),
        # 'depth_map' / 'distillation_feature' intentionally absent -> 0.0 contribution
    }
    gt = {
        'gt_seg': gt_seg,
        'gt_instance': gt_instance,
        'gt_offset_y': gt_offset_y,
        'gt_z': gt_z,
        'image_gt_segment': image_gt_segment,
        'image_gt_instance': image_gt_instance,
    }

    loss_dict = loss_calculator_forward(outputs, gt, is_train=True)
    jax.block_until_ready(loss_dict['loss_total_combined'])
    print("KERNEL_OK")
</pallas_src>

<mosaic_0001>
module attributes {stable_mosaic.version = 11 : i64} {
  func.func @_loss_sums_kernel(%arg0: i32, %arg1: memref<16x128xf32, #tpu.memory_space<vmem>>, %arg2: memref<16x128xf32, #tpu.memory_space<vmem>>, %arg3: memref<16x128xf32, #tpu.memory_space<vmem>>, %arg4: memref<16x128xf32, #tpu.memory_space<vmem>>, %arg5: memref<16x128xf32, #tpu.memory_space<vmem>>, %arg6: memref<16x128xf32, #tpu.memory_space<vmem>>, %arg7: memref<6x8x128xf32, #tpu.memory_space<vmem>>) attributes {dimension_semantics = [#tpu.dimension_semantics<arbitrary>], iteration_bounds = array<i64: 1>, scalar_prefetch = 0 : i64, scratch_operands = 0 : i64, tpu.core_type = #tpu.core_type<tc>, window_params = [{transform_indices = @transform_0, window_bounds = array<i64: 16, 128>}, {transform_indices = @transform_1, window_bounds = array<i64: 16, 128>}, {transform_indices = @transform_2, window_bounds = array<i64: 16, 128>}, {transform_indices = @transform_3, window_bounds = array<i64: 16, 128>}, {transform_indices = @transform_4, window_bounds = array<i64: 16, 128>}, {transform_indices = @transform_5, window_bounds = array<i64: 16, 128>}, {pipeline_mode = #tpu.pipeline_mode<synchronous>, transform_indices = @transform_6, window_bounds = array<i64: 6, 8, 128>}]} {
    %c0_i32 = arith.constant 0 : i32
    %0 = arith.cmpi eq, %arg0, %c0_i32 : i32
    %1 = arith.extui %0 : i1 to i32
    %c0_i32_0 = arith.constant 0 : i32
    %2 = arith.cmpi ne, %1, %c0_i32_0 : i32
    scf.if %2 {
      %cst_41 = arith.constant 0.000000e+00 : f32
      %94 = vector.broadcast %cst_41 : f32 to vector<6x8x128xf32>
      %c0_42 = arith.constant 0 : index
      %c0_43 = arith.constant 0 : index
      %c0_44 = arith.constant 0 : index
      %95 = vector.load %arg7[%c0_42, %c0_43, %c0_44] : memref<6x8x128xf32, #tpu.memory_space<vmem>>, vector<6x8x128xf32>
      tpu.vector_store %arg7[%c0_42, %c0_43, %c0_44], %94 {strides = array<i32>} : memref<6x8x128xf32, #tpu.memory_space<vmem>>, vector<6x8x128xf32>,
    } else {
    }
    %c0 = arith.constant 0 : index
    %c0_1 = arith.constant 0 : index
    %3 = vector.load %arg1[%c0, %c0_1] : memref<16x128xf32, #tpu.memory_space<vmem>>, vector<16x128xf32>
    %c0_2 = arith.constant 0 : index
    %c0_3 = arith.constant 0 : index
    %4 = vector.load %arg2[%c0_2, %c0_3] : memref<16x128xf32, #tpu.memory_space<vmem>>, vector<16x128xf32>
    %5 = math.absf %3 : vector<16x128xf32>
    %cst = arith.constant 0.000000e+00 : f32
    %6 = vector.broadcast %cst : f32 to vector<16x128xf32>
    %7 = arith.subf %6, %5 : vector<16x128xf32>
    %8 = math.exp %7 : vector<16x128xf32>
    %9 = math.log1p %8 : vector<16x128xf32>
    %cst_4 = arith.constant 0.000000e+00 : f32
    %10 = vector.broadcast %cst_4 : f32 to vector<16x128xf32>
    %11 = arith.maximumf %3, %10 : vector<16x128xf32>
    %12 = arith.addf %11, %9 : vector<16x128xf32>
    %13 = arith.subf %12, %3 : vector<16x128xf32>
    %cst_5 = arith.constant 0.000000e+00 : f32
    %14 = vector.broadcast %cst_5 : f32 to vector<16x128xf32>
    %15 = arith.cmpf oge, %3, %14 : vector<16x128xf32>
    %cst_6 = arith.constant 1.000000e+00 : f32
    %16 = vector.broadcast %cst_6 : f32 to vector<16x128xf32>
    %17 = arith.select %15, %16, %8 : vector<16x128xi1>, vector<16x128xf32>
    %cst_7 = arith.constant 1.000000e+00 : f32
    %18 = vector.broadcast %cst_7 : f32 to vector<16x128xf32>
    %19 = arith.addf %18, %8 : vector<16x128xf32>
    %20 = tpu.reciprocal %19 {approx = true} : vector<16x128xf32> -> vector<16x128xf32>
    %21 = arith.mulf %17, %20 : vector<16x128xf32>
    %cst_8 = arith.constant 1.000000e+01 : f32
    %22 = vector.broadcast %cst_8 : f32 to vector<16x128xf32>
    %23 = arith.mulf %22, %4 : vector<16x128xf32>
    %24 = arith.mulf %23, %13 : vector<16x128xf32>
    %cst_9 = arith.constant 1.000000e+00 : f32
    %25 = vector.broadcast %cst_9 : f32 to vector<16x128xf32>
    %26 = arith.subf %25, %4 : vector<16x128xf32>
    %27 = arith.mulf %26, %12 : vector<16x128xf32>
    %28 = arith.addf %24, %27 : vector<16x128xf32>
    %29 = vector.shape_cast %28 : vector<16x128xf32> to vector<2x8x128xf32>
    %cst_10 = arith.constant dense<0.000000e+00> : vector<8x128xf32>
    %30 = vector.multi_reduction <add>, %29, %cst_10 [0] : vector<2x8x128xf32> to vector<8x128xf32>
    %31 = vector.shape_cast %21 : vector<16x128xf32> to vector<2x8x128xf32>
    %cst_11 = arith.constant dense<0.000000e+00> : vector<8x128xf32>
    %32 = vector.multi_reduction <add>, %31, %cst_11 [0] : vector<2x8x128xf32> to vector<8x128xf32>
    %33 = vector.shape_cast %4 : vector<16x128xf32> to vector<2x8x128xf32>
    %cst_12 = arith.constant dense<0.000000e+00> : vector<8x128xf32>
    %34 = vector.multi_reduction <add>, %33, %cst_12 [0] : vector<2x8x128xf32> to vector<8x128xf32>
    %35 = arith.mulf %21, %4 : vector<16x128xf32>
    %36 = vector.shape_cast %35 : vector<16x128xf32> to vector<2x8x128xf32>
    %cst_13 = arith.constant dense<0.000000e+00> : vector<8x128xf32>
    %37 = vector.multi_reduction <add>, %36, %cst_13 [0] : vector<2x8x128xf32> to vector<8x128xf32>
    %c0_14 = arith.constant 0 : index
    %c0_15 = arith.constant 0 : index
    %38 = vector.load %arg3[%c0_14, %c0_15] : memref<16x128xf32, #tpu.memory_space<vmem>>, vector<16x128xf32>
    %c0_16 = arith.constant 0 : index
    %c0_17 = arith.constant 0 : index
    %39 = vector.load %arg5[%c0_16, %c0_17] : memref<16x128xf32, #tpu.memory_space<vmem>>, vector<16x128xf32>
    %40 = math.absf %38 : vector<16x128xf32>
    %cst_18 = arith.constant 0.000000e+00 : f32
    %41 = vector.broadcast %cst_18 : f32 to vector<16x128xf32>
    %42 = arith.subf %41, %40 : vector<16x128xf32>
    %43 = math.exp %42 : vector<16x128xf32>
    %44 = math.log1p %43 : vector<16x128xf32>
    %cst_19 = arith.constant 0.000000e+00 : f32
    %45 = vector.broadcast %cst_19 : f32 to vector<16x128xf32>
    %46 = arith.maximumf %38, %45 : vector<16x128xf32>
    %47 = arith.addf %46, %44 : vector<16x128xf32>
    %48 = arith.subf %47, %38 : vector<16x128xf32>
    %cst_20 = arith.constant 5.000000e-01 : f32
    %49 = vector.broadcast %cst_20 : f32 to vector<16x128xf32>
    %50 = arith.cmpf ogt, %4, %49 : vector<16x128xf32>
    %cst_21 = arith.constant 1.000000e+02 : f32
    %51 = vector.broadcast %cst_21 : f32 to vector<16x128xf32>
    %52 = arith.minimumf %48, %51 : vector<16x128xf32>
    %53 = arith.mulf %39, %52 : vector<16x128xf32>
    %cst_22 = arith.constant 1.000000e+00 : f32
    %54 = vector.broadcast %cst_22 : f32 to vector<16x128xf32>
    %55 = arith.subf %54, %39 : vector<16x128xf32>
    %cst_23 = arith.constant 1.000000e+02 : f32
    %56 = vector.broadcast %cst_23 : f32 to vector<16x128xf32>
    %57 = arith.minimumf %47, %56 : vector<16x128xf32>
    %58 = arith.mulf %55, %57 : vector<16x128xf32>
    %59 = arith.addf %53, %58 : vector<16x128xf32>
    %cst_24 = arith.constant 1.000000e+02 : f32
    %60 = vector.broadcast %cst_24 : f32 to vector<16x128xf32>
    %61 = arith.mulf %60, %39 : vector<16x128xf32>
    %62 = arith.select %50, %59, %61 : vector<16x128xi1>, vector<16x128xf32>
    %63 = vector.shape_cast %62 : vector<16x128xf32> to vector<2x8x128xf32>
    %cst_25 = arith.constant dense<0.000000e+00> : vector<8x128xf32>
    %64 = vector.multi_reduction <add>, %63, %cst_25 [0] : vector<2x8x128xf32> to vector<8x128xf32>
    %c0_26 = arith.constant 0 : index
    %c0_27 = arith.constant 0 : index
    %65 = vector.load %arg4[%c0_26, %c0_27] : memref<16x128xf32, #tpu.memory_space<vmem>>, vector<16x128xf32>
    %66 = math.absf %65 : vector<16x128xf32>
    %cst_28 = arith.constant 0.000000e+00 : f32
    %67 = vector.broadcast %cst_28 : f32 to vector<16x128xf32>
    %68 = arith.subf %67, %66 : vector<16x128xf32>
    %69 = math.exp %68 : vector<16x128xf32>
    %cst_29 = arith.constant 0.000000e+00 : f32
    %70 = vector.broadcast %cst_29 : f32 to vector<16x128xf32>
    %71 = arith.cmpf oge, %65, %70 : vector<16x128xf32>
    %cst_30 = arith.constant 1.000000e+00 : f32
    %72 = vector.broadcast %cst_30 : f32 to vector<16x128xf32>
    %73 = arith.select %71, %72, %69 : vector<16x128xi1>, vector<16x128xf32>
    %cst_31 = arith.constant 1.000000e+00 : f32
    %74 = vector.broadcast %cst_31 : f32 to vector<16x128xf32>
    %75 = arith.addf %74, %69 : vector<16x128xf32>
    %76 = tpu.reciprocal %75 {approx = true} : vector<16x128xf32> -> vector<16x128xf32>
    %77 = arith.mulf %73, %76 : vector<16x128xf32>
    %78 = arith.mulf %77, %4 : vector<16x128xf32>
    %c0_32 = arith.constant 0 : index
    %c0_33 = arith.constant 0 : index
    %79 = vector.load %arg6[%c0_32, %c0_33] : memref<16x128xf32, #tpu.memory_space<vmem>>, vector<16x128xf32>
    %80 = arith.subf %78, %79 : vector<16x128xf32>
    %81 = arith.mulf %80, %80 : vector<16x128xf32>
    %82 = vector.shape_cast %81 : vector<16x128xf32> to vector<2x8x128xf32>
    %cst_34 = arith.constant dense<0.000000e+00> : vector<8x128xf32>
    %83 = vector.multi_reduction <add>, %82, %cst_34 [0] : vector<2x8x128xf32> to vector<8x128xf32>
    %c0_35 = arith.constant 0 : index
    %c0_36 = arith.constant 0 : index
    %c0_37 = arith.constant 0 : index
    %84 = vector.load %arg7[%c0_35, %c0_36, %c0_37] : memref<6x8x128xf32, #tpu.memory_space<vmem>>, vector<6x8x128xf32>
    %85 = vector.shape_cast %30 : vector<8x128xf32> to vector<1x8x128xf32>
    %86 = vector.shape_cast %32 : vector<8x128xf32> to vector<1x8x128xf32>
    %87 = vector.shape_cast %34 : vector<8x128xf32> to vector<1x8x128xf32>
    %88 = vector.shape_cast %37 : vector<8x128xf32> to vector<1x8x128xf32>
    %89 = vector.shape_cast %64 : vector<8x128xf32> to vector<1x8x128xf32>
    %90 = vector.shape_cast %83 : vector<8x128xf32> to vector<1x8x128xf32>
    %91 = tpu.concatenate %85, %86, %87, %88, %89, %90 in 0 : vector<1x8x128xf32>, vector<1x8x128xf32>, vector<1x8x128xf32>, vector<1x8x128xf32>, vector<1x8x128xf32>, vector<1x8x128xf32> -> vector<6x8x128xf32>
    %92 = arith.addf %84, %91 : vector<6x8x128xf32>
    %c0_38 = arith.constant 0 : index
    %c0_39 = arith.constant 0 : index
    %c0_40 = arith.constant 0 : index
    %93 = vector.load %arg7[%c0_38, %c0_39, %c0_40] : memref<6x8x128xf32, #tpu.memory_space<vmem>>, vector<6x8x128xf32>
    tpu.vector_store %arg7[%c0_38, %c0_39, %c0_40], %92 {strides = array<i32>} : memref<6x8x128xf32, #tpu.memory_space<vmem>>, vector<6x8x128xf32>,
    return
  }
  func.func @transform_0(%arg0: i32) -> (i32, i32) {
    %c0_i32 = arith.constant 0 : i32
    %c0_i32_0 = arith.constant 0 : i32
    return %arg0, %c0_i32 : i32, i32
  }
  func.func @transform_1(%arg0: i32) -> (i32, i32) {
    %c0_i32 = arith.constant 0 : i32
    %c0_i32_0 = arith.constant 0 : i32
    return %arg0, %c0_i32 : i32, i32
  }
  func.func @transform_2(%arg0: i32) -> (i32, i32) {
    %c0_i32 = arith.constant 0 : i32
    %c0_i32_0 = arith.constant 0 : i32
    return %arg0, %c0_i32 : i32, i32
  }
  func.func @transform_3(%arg0: i32) -> (i32, i32) {
    %c0_i32 = arith.constant 0 : i32
    %c0_i32_0 = arith.constant 0 : i32
    return %arg0, %c0_i32 : i32, i32
  }
  func.func @transform_4(%arg0: i32) -> (i32, i32) {
    %c0_i32 = arith.constant 0 : i32
    %c0_i32_0 = arith.constant 0 : i32
    return %arg0, %c0_i32 : i32, i32
  }
  func.func @transform_5(%arg0: i32) -> (i32, i32) {
    %c0_i32 = arith.constant 0 : i32
    %c0_i32_0 = arith.constant 0 : i32
    return %arg0, %c0_i32 : i32, i32
  }
  func.func @transform_6(%arg0: i32) -> (i32, i32, i32) {
    %c0_i32 = arith.constant 0 : i32
    %c0_i32_0 = arith.constant 0 : i32
    %c0_i32_1 = arith.constant 0 : i32
    %c0_i32_2 = arith.constant 0 : i32
    return %c0_i32, %c0_i32_0, %c0_i32_1 : i32, i32, i32
  }
}

</mosaic_0001>

<bundles_post_ra>
// kernel: tpu_custom_call.1
= control target key start
LH: loop header
LB: loop body
LE: loop exit
PB: predicated region body
PF: predicated region fallthrough
CT: control target
= control target key end

     0   :  { %11 = vsyncpa [#allocation3], 0  ;;  %s696_s0 = inlined_call_operand.hbm [shape: f32[16,128], index: 0, kind: input, shape index: {}]   ;;  %s697_s1 = inlined_call_operand.hbm [shape: f32[16,128], index: 1, kind: input, shape index: {}]   ;;  %s698_s2 = inlined_call_operand.hbm [shape: f32[16,128], index: 2, kind: input, shape index: {}]   ;;  %s699_s3 = inlined_call_operand.hbm [shape: f32[16,128], index: 3, kind: input, shape index: {}]   ;;  %s700_s4 = inlined_call_operand.hbm [shape: f32[16,128], index: 4, kind: input, shape index: {}]   ;;  %s701_s5 = inlined_call_operand.hbm [shape: f32[16,128], index: 5, kind: input, shape index: {}]   ;;  %s702_s6 = inlined_call_operand.hbm [shape: f32[6,8,128], index: 6, kind: output, shape index: {}]  }
   0x1   :  { %12 = vsyncpa [#allocation6], 0 }
   0x2   :  { %13 = vsyncpa [#allocation9], 0 }
   0x3   :  { %14 = vsyncpa [#allocation12], 0 }
   0x4   :  { %15 = vsyncpa [#allocation4], 0  ;;  %s33_s23 = sshll.u32 %s697_s1, 4  ;;  %s530_s24 = smov [#allocation5]   ;;  %s34_s23 = int_to_ptr.hbm [resolvable:$true] %s33_s23 }
   0x5   :  { %s35_s25 = sshll.u32 %s530_s24, 4  ;;  %s59_s28 = sshll.u32 %s699_s3, 4  ;;  %s36_s25 = int_to_ptr.vmem [resolvable:$true] %s35_s25  ;;  %s60_s28 = int_to_ptr.hbm [resolvable:$true] %s59_s28 }
   0x6   :  { %s531_s29 = smov 128   ;;  %s532_s30 = smov 8  }
   0x7   :  { %41 = dma.hbm_to_vmem [thread:$0]  %s34_s23, 256, %s36_s25, [#allocation6], %s531_s29, %s531_s29, %s532_s30  }
   0x8   :  { %s533_s7 = smov [#allocation8]   ;;  %s20_s1 = sshll.u32 %s696_s0, 4  ;;  %s21_s1 = int_to_ptr.hbm [resolvable:$true] %s20_s1 }
   0x9   :  { %s61_s8 = sshll.u32 %s533_s7, 4  ;;  %s46_s12 = sshll.u32 %s698_s2, 4  ;;  %s62_s8 = int_to_ptr.vmem [resolvable:$true] %s61_s8  ;;  %s47_s12 = int_to_ptr.hbm [resolvable:$true] %s46_s12 }
   0xa   :  { %67 = dma.hbm_to_vmem [thread:$0]  %s60_s28, 256, %s62_s8, [#allocation9], %s531_s29, %s531_s29, %s532_s30  }
   0xb   :  { %s534_s13 = smov [#allocation2]   ;;  %s535_s15 = smov [#allocation7]  }
   0xc   :  { %s22_s14 = sshll.u32 %s534_s13, 4  ;;  %s48_s0 = sshll.u32 %s535_s15, 4  ;;  %s23_s14 = int_to_ptr.vmem [resolvable:$true] %s22_s14  ;;  %s49_s0 = int_to_ptr.vmem [resolvable:$true] %s48_s0 }
   0xd   :  { %28 = dma.hbm_to_vmem [thread:$0]  %s21_s1, 256, %s23_s14, [#allocation3], %s531_s29, %s531_s29, %s532_s30  }
   0xe   :  { %s72_s18 = sshll.u32 %s700_s4, 4  ;;  %s85_s20 = sshll.u32 %s701_s5, 4  ;;  %s73_s18 = int_to_ptr.hbm [resolvable:$true] %s72_s18  ;;  %s86_s20 = int_to_ptr.hbm [resolvable:$true] %s85_s20 }
   0xf   :  { %54 = dma.hbm_to_vmem [thread:$0]  %s47_s12, 256, %s49_s0, [#allocation6], %s531_s29, %s531_s29, %s532_s30  }
  0x10   :  { %s536_s21 = smov [#allocation10]   ;;  %s537_s23 = smov [#allocation11]  }
  0x11   :  { %s74_s22 = sshll.u32 %s536_s21, 4  ;;  %s87_s4 = sshll.u32 %s537_s23, 4  ;;  %s75_s22 = int_to_ptr.vmem [resolvable:$true] %s74_s22  ;;  %s88_s4 = int_to_ptr.vmem [resolvable:$true] %s87_s4 }
  0x12   :  { %80 = dma.hbm_to_vmem [thread:$0]  %s73_s18, 256, %s75_s22, [#allocation9], %s531_s29, %s531_s29, %s532_s30  }
  0x13   :  { %93 = dma.hbm_to_vmem [thread:$0]  %s86_s20, 256, %s88_s4, [#allocation12], %s531_s29, %s531_s29, %s532_s30  }
  0x14   :  { %520 = dma.done.wait [#allocation3], 256  }
  0x15   :  { %521 = vsyncadd [#allocation3], 4294967040 }
  0x16   :  { %522 = dma.done.wait [#allocation6], 512  }
  0x17   :  { %523 = vsyncadd [#allocation6], 4294966784 }
  0x18   :  { %524 = dma.done.wait [#allocation9], 512  }
  0x19   :  { %525 = vsyncadd [#allocation9], 4294966784 }
  0x1a   :  { %526 = dma.done.wait [#allocation12], 256  }
  0x1b   :  { %527 = vsyncadd [#allocation12], 4294967040  ;;  %v610_v0 = vld [vmem:[#allocation2] sm:$0xff]  ;;  %v612_v1 = vld [vmem:[#allocation2 + $0x8] sm:$0xff]  ;;  %s538_s5 = smov [#allocation13]   ;;  %s298_s27 = sshll.u32 %s702_s6, 4  ;;  %s299_s27 = int_to_ptr.hbm [resolvable:$true] %s298_s27 }
  0x1c   :  { %v132_v2 = vand.u32 2147483647, %v610_v0  ;;  %v133_v3 = vand.u32 2147483647, %v612_v1  ;;  %v616_v4 = vld [vmem:[#allocation7] sm:$0xff]  ;;  %v618_v5 = vld [vmem:[#allocation7 + $0x8] sm:$0xff] }
  0x1d   :  { %v620_v8 = vld [vmem:[#allocation5] sm:$0xff]  ;;  %v622_v9 = vld [vmem:[#allocation5 + $0x8] sm:$0xff]  ;;  %v194_v10 = vand.u32 2147483647, %v616_v4  ;;  %v195_v11 = vand.u32 2147483647, %v618_v5 }
  0x1e   :  { %v134_v6 = vsub.f32 0.0, %v132_v2  ;;  %v135_v7 = vsub.f32 0.0, %v133_v3  ;;  %v186_v14 = vadd.f32 %v622_v9, %v620_v8  ;;  %v628_v17 = vld [vmem:[#allocation8] sm:$0xff]  ;;  %v630_v20 = vld [vmem:[#allocation8 + $0x8] sm:$0xff]  ;;  %v158_v24 = vmax.f32 %v610_v0, 0.0  ;;  %s296_s24 = sshll.u32 %s538_s5, 4  ;;  %s297_s24 = int_to_ptr.vmem [resolvable:$true] %s296_s24 }
  0x1f   :  { %v196_v15 = vsub.f32 0.0, %v194_v10  ;;  %v197_v16 = vsub.f32 0.0, %v195_v11  ;;  %v247_v21 = vand.u32 2147483647, %v628_v17  ;;  %v248_v22 = vand.u32 2147483647, %v630_v20 }
  0x20   :  { %v136_v12 = vmul.f32 1.442695, %v134_v6  ;;  %v138_v13 = vmul.f32 1.442695, %v135_v7  ;;  %288 = vst [vmem:[#allocation13 + $0x10] sm:$0xff] %v186_v14  ;;  %v159_v29 = vmax.f32 %v612_v1, 0.0 }
  0x21   :  { %v198_v18 = vmul.f32 1.442695, %v196_v15  ;;  %v200_v19 = vmul.f32 1.442695, %v197_v16  ;;  %v249_v25 = vsub.f32 0.0, %v247_v21  ;;  %v637_v30 = vmul.f32 10.0, %v620_v8 }
  0x22   :  { %324 = vpow2.f32 %v136_v12  ;;  %v640_v33 = vmul.f32 10.0, %v622_v9  ;;  %v178_v34 = vsub.f32 1.0, %v620_v8  ;;  %vm164_vm0 = vcmp.ge.f32.partialorder %v610_v0, 0.0 }
  0x23   :  { %326 = vpow2.f32 %v138_v13  ;;  %vm165_vm1 = vcmp.ge.f32.partialorder %v612_v1, 0.0  ;;  %v250_v36 = vsub.f32 0.0, %v248_v22  ;;  %v251_v40 = vmul.f32 1.442695, %v249_v25 }
  0x24   :  { %328 = vpow2.f32 %v198_v18  ;;  %v179_v47 = vsub.f32 1.0, %v622_v9  ;;  %v220_v2 = vmax.f32 %v616_v4, 0.0  ;;  %v221_v3 = vmax.f32 %v618_v5, 0.0 }
  0x25   :  { %330 = vpow2.f32 %v200_v19  ;;  %v253_v49 = vmul.f32 1.442695, %v250_v36  ;;  %vm255_vm6 = vcmp.ge.f32.partialorder %v628_v17, 0.0  ;;  %vm226_vm7 = vcmp.gt.f32.partialorder %v620_v8, 0.5 }
  0x26   :  { %vm256_vm8 = vcmp.ge.f32.partialorder %v630_v20, 0.0  ;;  %vm227_vm9 = vcmp.gt.f32.partialorder %v622_v9, 0.5  ;;  %v268_v20 = vld [vmem:[#allocation11 + $0x8] sm:$0xff] }
  0x28   :  { %v325_v23 = vpop.eup %324 }
  0x29   :  { %v327_v26 = vpop.eup %326  ;;  %v140_v27 = vadd.f32 1.0, %v325_v23  ;;  %v143_v28 = vmul.f32 -0.5, %v325_v23  ;;  %v146_v41 = vand.u32 2147483647, %v325_v23  ;;  %v166_v48 = vsel %vm164_vm0, 1.0, %v325_v23 }
  0x2a   :  { %v149_v31 = vadd.f32 1.0, %v327_v26  ;;  %v152_v32 = vmul.f32 -0.5, %v327_v26  ;;  %v329_v35 = vpop.eup %328  ;;  %v155_v44 = vand.u32 2147483647, %v327_v26  ;;  %v167_v56 = vsel %vm165_vm1, 1.0, %v327_v26 }
  0x2b   :  { %332 = vlog2.f32 %v140_v27  ;;  %v331_v37 = vpop.eup %330  ;;  %v144_v38 = vadd.f32 1.0, %v143_v28  ;;  %v202_v39 = vadd.f32 1.0, %v329_v35  ;;  %v205_v43 = vmul.f32 -0.5, %v329_v35 }
  0x2c   :  { %334 = vlog2.f32 %v149_v31  ;;  %v153_v42 = vadd.f32 1.0, %v152_v32  ;;  %v211_v45 = vadd.f32 1.0, %v331_v37  ;;  %v214_v46 = vmul.f32 -0.5, %v331_v37  ;;  %v192_v32 = vld [vmem:[#allocation10] sm:$0xff] }
  0x2d   :  { %336 = vrcp.f32 %v140_v27  ;;  %v145_v50 = vmul.f32 %v325_v23, %v144_v38  ;;  %v206_v51 = vadd.f32 1.0, %v205_v43  ;;  %v208_v52 = vand.u32 2147483647, %v329_v35 }
  0x2e   :  { %338 = vrcp.f32 %v149_v31  ;;  %vm648_vm2 = vcmp.lt.f32.partialorder %v146_v41, 0.0004427343  ;;  %v154_v55 = vmul.f32 %v327_v26, %v153_v42  ;;  %v217_v57 = vand.u32 2147483647, %v331_v37 }
  0x2f   :  { %340 = vlog2.f32 %v202_v39  ;;  %vm654_vm3 = vcmp.lt.f32.partialorder %v155_v44, 0.0004427343  ;;  %v215_v61 = vadd.f32 1.0, %v214_v46  ;;  %v207_v11 = vmul.f32 %v329_v35, %v206_v51  ;;  %v193_v35 = vld [vmem:[#allocation10 + $0x8] sm:$0xff] }
  0x30   :  { %342 = vlog2.f32 %v211_v45  ;;  %vm662_vm4 = vcmp.lt.f32.partialorder %v208_v52, 0.0004427343  ;;  %vm668_vm5 = vcmp.lt.f32.partialorder %v217_v57, 0.0004427343  ;;  %v232_v43 = vsub.f32 1.0, %v192_v32 }
  0x31   :  { %v333_v53 = vpop.eup %332  ;;  %344 = vpow2.f32 %v251_v40  ;;  %v216_v25 = vmul.f32 %v331_v37, %v215_v61  ;;  %v233_v44 = vsub.f32 1.0, %v193_v35 }
  0x32   :  { %v335_v58 = vpop.eup %334  ;;  %v142_v59 = vmul.f32 0.6931472, %v333_v53  ;;  %346 = vpow2.f32 %v253_v49 }
  0x33   :  { %v337_v62 = vpop.eup %336  ;;  %v151_v63 = vmul.f32 0.6931472, %v335_v58 }
  0x34   :  { %v339_v6 = vpop.eup %338  ;;  %v148_v7 = vsel %vm648_vm2, %v145_v50, %v142_v59  ;;  %v172_v10 = vmul.f32 %v337_v62, %v166_v48  ;;  %v241_v59 = vmul.f32 100.0, %v193_v35 }
  0x35   :  { %v341_v13 = vpop.eup %340  ;;  %v157_v14 = vsel %vm654_vm3, %v154_v55, %v151_v63  ;;  %v160_v15 = vadd.f32 %v158_v24, %v148_v7  ;;  %v173_v16 = vmul.f32 %v339_v6, %v167_v56 }
  0x36   :  { %v343_v19 = vpop.eup %342  ;;  %v161_v21 = vadd.f32 %v159_v29, %v157_v14  ;;  %v187_v22 = vmul.f32 %v172_v10, %v620_v8  ;;  %v204_v23 = vmul.f32 0.6931472, %v341_v13 }
  0x37   :  { %v162_v26 = vsub.f32 %v160_v15, %v610_v0  ;;  %v180_v27 = vmul.f32 %v178_v34, %v160_v15  ;;  %v185_v28 = vadd.f32 %v173_v16, %v172_v10  ;;  %v188_v31 = vmul.f32 %v173_v16, %v622_v9  ;;  %v345_v24 = vpop.eup %344  ;;  %v267_v10 = vld [vmem:[#allocation11] sm:$0xff] }
  0x38   :  { %v163_v36 = vsub.f32 %v161_v21, %v612_v1  ;;  %v181_v38 = vmul.f32 %v179_v47, %v161_v21  ;;  %v210_v39 = vsel %vm662_vm4, %v207_v11, %v204_v23  ;;  %v213_v29 = vmul.f32 0.6931472, %v343_v19  ;;  %v347_v40 = vpop.eup %346 }
  0x39   :  { %v176_v41 = vmul.f32 %v637_v30, %v162_v26  ;;  %v189_v37 = vadd.f32 %v188_v31, %v187_v22  ;;  %v222_v42 = vadd.f32 %v220_v2, %v210_v39  ;;  %287 = vst [vmem:[#allocation13 + $0x8] sm:$0xff] %v185_v28  ;;  %v259_v49 = vadd.f32 1.0, %v345_v24 }
  0x3a   :  { %v177_v0 = vmul.f32 %v640_v33, %v163_v36  ;;  %v219_v34 = vsel %vm668_vm5, %v216_v25, %v213_v29  ;;  %v260_v50 = vadd.f32 1.0, %v347_v40  ;;  %v240_v33 = vmul.f32 100.0, %v192_v32 }
  0x3b   :  { %v182_v45 = vadd.f32 %v180_v27, %v176_v41  ;;  %v223_v1 = vadd.f32 %v221_v3, %v219_v34  ;;  %v224_v46 = vsub.f32 %v222_v42, %v616_v4  ;;  %v234_v48 = vmin.f32 %v222_v42, 100.0  ;;  %289 = vst [vmem:[#allocation13 + $0x18] sm:$0xff] %v189_v37 }
  0x3c   :  { %v183_v47 = vadd.f32 %v181_v38, %v177_v0  ;;  %348 = vrcp.f32 %v259_v49  ;;  %v258_v62 = vsel %vm256_vm8, 1.0, %v347_v40 }
  0x3d   :  { %v225_v30 = vsub.f32 %v223_v1, %v618_v5  ;;  %v228_v51 = vmin.f32 %v224_v46, 100.0  ;;  %v235_v52 = vmin.f32 %v223_v1, 100.0  ;;  %v236_v54 = vmul.f32 %v234_v48, %v232_v43 }
  0x3e   :  { %v184_v53 = vadd.f32 %v183_v47, %v182_v45  ;;  %350 = vrcp.f32 %v260_v50  ;;  %v257_v5 = vsel %vm255_vm6, 1.0, %v345_v24 }
  0x3f   :  { %v229_v55 = vmin.f32 %v225_v30, 100.0  ;;  %v230_v56 = vmul.f32 %v228_v51, %v192_v32  ;;  %v237_v57 = vmul.f32 %v235_v52, %v233_v44 }
  0x40   :  { %286 = vst [vmem:[#allocation13] sm:$0xff] %v184_v53 }
  0x41   :  { %v231_v4 = vmul.f32 %v229_v55, %v193_v35  ;;  %v238_v58 = vadd.f32 %v236_v54, %v230_v56 }
  0x42   :  { %v349_v17 = vpop.eup %348 }
  0x43   :  { %v239_v60 = vadd.f32 %v237_v57, %v231_v4  ;;  %v242_v61 = vsel %vm226_vm7, %v238_v58, %v240_v33  ;;  %v263_v3 = vmul.f32 %v349_v17, %v257_v5 }
  0x44   :  { %v351_v63 = vpop.eup %350 }
  0x45   :  { %v243_v2 = vsel %vm227_vm9, %v239_v60, %v241_v59  ;;  %v264_v7 = vmul.f32 %v351_v63, %v258_v62  ;;  %v265_v11 = vmul.f32 %v263_v3, %v620_v8 }
  0x46   :  { %v244_v6 = vadd.f32 %v243_v2, %v242_v61 }
  0x47   :  { %v266_v12 = vmul.f32 %v264_v7, %v622_v9  ;;  %v269_v13 = vsub.f32 %v265_v11, %v267_v10 }
  0x48   :  { %290 = vst [vmem:[#allocation13 + $0x20] sm:$0xff] %v244_v6 }
  0x49   :  { %v270_v14 = vsub.f32 %v266_v12, %v268_v20  ;;  %v271_v15 = vmul.f32 %v269_v13, %v269_v13 }
  0x4b   :  { %v272_v16 = vmul.f32 %v270_v14, %v270_v14 }
  0x4d   :  { %v273_v18 = vadd.f32 %v272_v16, %v271_v15 }
  0x4f   :  { %291 = vst [vmem:[#allocation13 + $0x28] sm:$0xff] %v273_v18 }
  0x50   :  { %304 = dma.vmem_to_hbm [thread:$0]  %s297_s24, 768, %s299_s27, [#allocation4], %s531_s29, %s531_s29, %s532_s30  }
  0x51   :  { %528 = dma.done.wait [#allocation4], 768  }
  0x52   :  { %529 = vsyncadd [#allocation4], 4294966528 }
  0x53   :  { %309 = vsyncpa [#allocation3], 1 }
  0x54   :  { %310 = vsyncpa [#allocation6], 1 }
  0x55   :  { %311 = vsyncpa [#allocation9], 1 }
  0x56   :  { %312 = vsyncpa [#allocation12], 1 }
  0x57   :  { %313 = vsyncpa [#allocation4], 1 }

</bundles_post_ra>
